<compile_context>
chip_gen: v7x
topology: tpu7x:2x2x1
jax: 0.10.0
libtpu: 0.0.40
codegen_flags: <defaults>
</compile_context>

<pallas_src>
import math
import functools

import jax
import jax.numpy as jnp
from jax.experimental import pallas as pl
from jax.experimental.pallas import tpu as pltpu

MIN_LOG_STD = -6.0
MAX_LOG_STD = 0.0


def _actor_kernel(obsT_ref, epsT_ref, w1_ref, b1_ref, w2_ref, b2_ref,
                  wmu_ref, bmu_ref, std_ref,
                  actT_ref, logp_ref, *, act_limit):
    # --- MLP trunk: Linear -> ReLU -> Linear -> ReLU (output_activation == activation) ---
    # Batch on lanes: x is [obs_dim, tile_b]; weights are [out, in] (PyTorch layout),
    # so each layer is W @ x.  bf16 MXU inputs, f32 accumulation; epilogue stays f32.
    x = obsT_ref[...].astype(jnp.bfloat16)                              # [obs_dim, tile_b]
    h1 = jnp.dot(w1_ref[...], x, preferred_element_type=jnp.float32)    # [h1, tile_b]
    h1 = jnp.maximum(h1 + b1_ref[...], 0.0)
    h2 = jnp.dot(w2_ref[...], h1.astype(jnp.bfloat16),
                 preferred_element_type=jnp.float32)                    # [h2, tile_b]
    h2 = jnp.maximum(h2 + b2_ref[...], 0.0)

    # --- mu head ---
    mu = jnp.dot(wmu_ref[...], h2.astype(jnp.bfloat16),
                 preferred_element_type=jnp.float32) + bmu_ref[...]     # [A, tile_b]
    mu = jnp.tanh(mu) * act_limit

    # --- rsample: pi = mu + std * eps  (eps == 0 => deterministic path, pi == mu) ---
    eps = epsT_ref[...]                     # [A, tile_b] f32
    std = std_ref[...]                      # [A, 1] f32, broadcasts across lanes
    pi = mu + std * eps
    actT_ref[...] = pi.astype(actT_ref.dtype)

    # --- Normal(mu, std).log_prob(pi).sum(-1), batch-varying part only ---
    # (pi - mu)/std == eps exactly, so the per-column term is -0.5*sum(eps^2)
    # (sublane reduction -> XLU, lane-dense [1, tile_b] store).  The batch-constant
    # term -(sum(log_std) + A*0.5*log(2*pi)) is added in the wrapper.
    logp_ref[...] = (-0.5 * jnp.sum(eps * eps, axis=0, keepdims=True)
                     ).astype(logp_ref.dtype)


def prepare_params(params):
    """One-time parameter preparation (param-load time, not per call).

    - Keeps weights in PyTorch [out, in] layout, cast to bf16 (MXU-native).
    - Biases / std become [out, 1] f32 column vectors (lane-broadcast in kernel).
    - Precomputes std = exp(min + sigmoid(logits)*(max-min))   -> [A, 1]
    - Precomputes the batch-constant log-prob term
        lconst = -(sum(log_std) + A*0.5*log(2*pi))             -> f32 scalar
    """
    w1, b1, w2, b2, wmu, bmu, log_std_logits = params
    log_std = MIN_LOG_STD + jax.nn.sigmoid(log_std_logits) * (MAX_LOG_STD - MIN_LOG_STD)
    std = jnp.exp(log_std).reshape(-1, 1).astype(jnp.float32)
    A = std.shape[0]
    lconst = (-(jnp.sum(log_std) + A * 0.5 * math.log(2.0 * math.pi))).astype(jnp.float32)
    return (w1.astype(jnp.bfloat16), b1.reshape(-1, 1).astype(jnp.float32),
            w2.astype(jnp.bfloat16), b2.reshape(-1, 1).astype(jnp.float32),
            wmu.astype(jnp.bfloat16), bmu.reshape(-1, 1).astype(jnp.float32),
            std, lconst)


def _choose_tiling(B, max_tile_b):
    """Lane-dense batch tiling: tile_b is a multiple of 128; >=2 grid steps when
    the padded batch exceeds one tile of 128 (feeds both TCs on v7x)."""
    padded_b = max(128, ((B + 127) // 128) * 128)
    if padded_b <= 128:
        return padded_b, padded_b
    half = ((padded_b // 2 + 127) // 128) * 128     # ~half the batch, 128-aligned
    tile_b = min(max_tile_b, half)
    padded_b = ((padded_b + tile_b - 1) // tile_b) * tile_b
    return padded_b, tile_b


def awac_actor_forward(obs, prepared, eps, act_limit, *, max_tile_b=1024):
    """Fused awacMLPActor forward. Returns (pi_action [B, A], logp_pi [B])."""
    w1, b1, w2, b2, wmu, bmu, std, lconst = prepared
    B, obs_dim = obs.shape
    A = wmu.shape[0]

    padded_b, tile_b = _choose_tiling(B, max_tile_b)
    pad = padded_b - B

    # Layout plumbing only: present batch on the lane axis (lane-dense DMA/stores).
    obsT = jnp.pad(obs.T, ((0, 0), (0, pad)))       # [obs_dim, padded_b]
    epsT = jnp.pad(eps.T, ((0, 0), (0, pad)))       # [A, padded_b]

    grid = (padded_b // tile_b,)

    # Batch-tiled arrays follow the grid along the lane axis; parameters use a
    # constant index_map so they stay VMEM-resident with no re-DMA across steps.
    stream = lambda nrows: pl.BlockSpec((nrows, tile_b), lambda i: (0, i))
    resident = lambda shape: pl.BlockSpec(shape, lambda i: (0, 0))

    kernel = functools.partial(_actor_kernel, act_limit=float(act_limit))
    piT, logp_row = pl.pallas_call(
        kernel,
        grid=grid,
        in_specs=[
            stream(obs_dim),                # obs^T
            stream(A),                      # eps^T
            resident(w1.shape), resident(b1.shape),
            resident(w2.shape), resident(b2.shape),
            resident(wmu.shape), resident(bmu.shape),
            resident(std.shape),
        ],
        out_specs=[
            stream(A),                      # pi^T        (lane-dense)
            stream(1),                      # logp [1, B] (lane-dense)
        ],
        out_shape=[
            jax.ShapeDtypeStruct((A, padded_b), jnp.float32),
            jax.ShapeDtypeStruct((1, padded_b), jnp.float32),
        ],
        compiler_params=pltpu.CompilerParams(
            dimension_semantics=("parallel",),   # shards batch steps across TCs on v7x
        ),
    )(obsT, epsT, w1, b1, w2, b2, wmu, bmu, std)

    pi_action = piT[:, :B].T                           # [B, A]
    logp_pi = logp_row[0, :B] + lconst                 # add batch-constant term
    return pi_action, logp_pi


def init_params(key, obs_dim, hidden_sizes, act_dim):
    """Deterministic synthetic parameter init (PyTorch nn.Linear layout: W [out, in])."""
    h1, h2 = hidden_sizes
    ks = jax.random.split(key, 3)

    def lin(k, fan_in, fan_out):
        bound = 1.0 / math.sqrt(fan_in)
        kw, kb = jax.random.split(k)
        w = jax.random.uniform(kw, (fan_out, fan_in), jnp.float32, -bound, bound)
        b = jax.random.uniform(kb, (fan_out,), jnp.float32, -bound, bound)
        return w, b

    w1, b1 = lin(ks[0], obs_dim, h1)
    w2, b2 = lin(ks[1], h1, h2)
    wmu, bmu = lin(ks[2], h2, act_dim)
    log_std_logits = jnp.zeros((act_dim,), jnp.float32)  # nn.Parameter(torch.zeros(act_dim))
    return (w1, b1, w2, b2, wmu, bmu, log_std_logits)


def _reference_forward(obs, params, eps, act_limit):
    """Pure-JAX f32 reference (mirrors the PyTorch module)."""
    w1, b1, w2, b2, wmu, bmu, logits = params
    h1 = jnp.maximum(obs @ w1.T + b1, 0.0)
    h2 = jnp.maximum(h1 @ w2.T + b2, 0.0)
    mu = jnp.tanh(h2 @ wmu.T + bmu) * act_limit
    log_std = MIN_LOG_STD + jax.nn.sigmoid(logits) * (MAX_LOG_STD - MIN_LOG_STD)
    std = jnp.exp(log_std)
    pi = mu + std * eps
    z = (pi - mu) / std
    logp = -0.5 * z * z - log_std - 0.5 * math.log(2.0 * math.pi)
    return pi, jnp.sum(logp, axis=-1)


if __name__ == "__main__":
    key = jax.random.PRNGKey(0)
    k_obs, k_par, k_eps = jax.random.split(key, 3)

    B, OBS_DIM, ACT_DIM = 8, 16, 8
    HIDDEN = (32, 32)
    ACT_LIMIT = 1.0

    obs = jax.random.normal(k_obs, (B, OBS_DIM), jnp.float32)
    params = init_params(k_par, OBS_DIM, HIDDEN, ACT_DIM)
    prepared = prepare_params(params)

    # Stochastic path (deterministic=False): rsample noise generated host-side.
    # TODO(synk): optionally draw eps in-kernel via pltpu.prng_seed/stateful_normal.
    eps = jax.random.normal(k_eps, (B, ACT_DIM), jnp.float32)
    pi_action, logp_pi = awac_actor_forward(obs, prepared, eps, ACT_LIMIT)
    jax.block_until_ready((pi_action, logp_pi))

    # Deterministic path: pi_action == mu (eps = 0), logp == density at the mean.
    pi_det, logp_det = awac_actor_forward(obs, prepared, jnp.zeros_like(eps), ACT_LIMIT)
    jax.block_until_ready((pi_det, logp_det))

    assert pi_action.shape == (B, ACT_DIM) and logp_pi.shape == (B,)
    assert pi_det.shape == (B, ACT_DIM) and logp_det.shape == (B,)
    assert bool(jnp.all(jnp.isfinite(pi_action))) and bool(jnp.all(jnp.isfinite(logp_pi)))
    assert bool(jnp.all(jnp.isfinite(pi_det))) and bool(jnp.all(jnp.isfinite(logp_det)))

    # Check against the f32 reference (kernel matmuls are bf16 -> loose tol for pi;
    # logp is computed fully in f32 -> tight tol).
    ref_pi, ref_logp = _reference_forward(obs, params, eps, ACT_LIMIT)
    ref_pi_det, ref_logp_det = _reference_forward(obs, params, jnp.zeros_like(eps), ACT_LIMIT)
    assert bool(jnp.max(jnp.abs(pi_action - ref_pi)) < 0.15)
    assert bool(jnp.max(jnp.abs(logp_pi - ref_logp)) < 1e-2)
    assert bool(jnp.max(jnp.abs(pi_det - ref_pi_det)) < 0.15)
    assert bool(jnp.max(jnp.abs(logp_det - ref_logp_det)) < 1e-2)

    print("KERNEL_OK")
</pallas_src>

<mosaic_0001>
module attributes {stable_mosaic.version = 11 : i64} {
  func.func @_actor_kernel(%arg0: i32, %arg1: memref<16x128xf32, #tpu.memory_space<vmem>>, %arg2: memref<8x128xf32, #tpu.memory_space<vmem>>, %arg3: memref<32x16xbf16, #tpu.memory_space<vmem>>, %arg4: memref<32x1xf32, #tpu.memory_space<vmem>>, %arg5: memref<32x32xbf16, #tpu.memory_space<vmem>>, %arg6: memref<32x1xf32, #tpu.memory_space<vmem>>, %arg7: memref<8x32xbf16, #tpu.memory_space<vmem>>, %arg8: memref<8x1xf32, #tpu.memory_space<vmem>>, %arg9: memref<8x1xf32, #tpu.memory_space<vmem>>, %arg10: memref<8x128xf32, #tpu.memory_space<vmem>>, %arg11: memref<1x128xf32, #tpu.memory_space<vmem>>) attributes {dimension_semantics = [#tpu.dimension_semantics<parallel>], iteration_bounds = array<i64: 1>, scalar_prefetch = 0 : i64, scratch_operands = 0 : i64, tpu.core_type = #tpu.core_type<tc>, window_params = [{transform_indices = @transform_0, window_bounds = array<i64: 16, 128>}, {transform_indices = @transform_1, window_bounds = array<i64: 8, 128>}, {pipeline_mode = #tpu.pipeline_mode<synchronous>, transform_indices = @transform_2, window_bounds = array<i64: 32, 16>}, {pipeline_mode = #tpu.pipeline_mode<synchronous>, transform_indices = @transform_3, window_bounds = array<i64: 32, 1>}, {pipeline_mode = #tpu.pipeline_mode<synchronous>, transform_indices = @transform_4, window_bounds = array<i64: 32, 32>}, {pipeline_mode = #tpu.pipeline_mode<synchronous>, transform_indices = @transform_5, window_bounds = array<i64: 32, 1>}, {pipeline_mode = #tpu.pipeline_mode<synchronous>, transform_indices = @transform_6, window_bounds = array<i64: 8, 32>}, {pipeline_mode = #tpu.pipeline_mode<synchronous>, transform_indices = @transform_7, window_bounds = array<i64: 8, 1>}, {pipeline_mode = #tpu.pipeline_mode<synchronous>, transform_indices = @transform_8, window_bounds = array<i64: 8, 1>}, {transform_indices = @transform_9, window_bounds = array<i64: 8, 128>}, {transform_indices = @transform_10, window_bounds = array<i64: 1, 128>}]} {
    %c0 = arith.constant 0 : index
    %c0_0 = arith.constant 0 : index
    %0 = vector.load %arg1[%c0, %c0_0] : memref<16x128xf32, #tpu.memory_space<vmem>>, vector<16x128xf32>
    %1 = arith.truncf %0 : vector<16x128xf32> to vector<16x128xbf16>
    %c0_1 = arith.constant 0 : index
    %c0_2 = arith.constant 0 : index
    %2 = vector.load %arg3[%c0_1, %c0_2] : memref<32x16xbf16, #tpu.memory_space<vmem>>, vector<32x16xbf16>
    %cst = arith.constant dense<0.000000e+00> : vector<32x128xf32>
    %3 = tpu.matmul %2, %1, %cst {dimension_numbers = #tpu.dot_dimension_numbers<[1], [0], [0], [1], [0, 0, 1, 1], [], []>} : vector<32x16xbf16>, vector<16x128xbf16>, vector<32x128xf32> -> vector<32x128xf32>
    %c0_3 = arith.constant 0 : index
    %c0_4 = arith.constant 0 : index
    %4 = vector.load %arg4[%c0_3, %c0_4] : memref<32x1xf32, #tpu.memory_space<vmem>>, vector<32x1xf32>
    %5 = vector.broadcast %4 : vector<32x1xf32> to vector<32x128xf32>
    %6 = arith.addf %3, %5 : vector<32x128xf32>
    %cst_5 = arith.constant 0.000000e+00 : f32
    %7 = vector.broadcast %cst_5 : f32 to vector<32x128xf32>
    %8 = arith.maximumf %6, %7 : vector<32x128xf32>
    %c0_6 = arith.constant 0 : index
    %c0_7 = arith.constant 0 : index
    %9 = vector.load %arg5[%c0_6, %c0_7] : memref<32x32xbf16, #tpu.memory_space<vmem>>, vector<32x32xbf16>
    %10 = arith.truncf %8 : vector<32x128xf32> to vector<32x128xbf16>
    %cst_8 = arith.constant dense<0.000000e+00> : vector<32x128xf32>
    %11 = tpu.matmul %9, %10, %cst_8 {dimension_numbers = #tpu.dot_dimension_numbers<[1], [0], [0], [1], [0, 0, 1, 1], [], []>} : vector<32x32xbf16>, vector<32x128xbf16>, vector<32x128xf32> -> vector<32x128xf32>
    %c0_9 = arith.constant 0 : index
    %c0_10 = arith.constant 0 : index
    %12 = vector.load %arg6[%c0_9, %c0_10] : memref<32x1xf32, #tpu.memory_space<vmem>>, vector<32x1xf32>
    %13 = vector.broadcast %12 : vector<32x1xf32> to vector<32x128xf32>
    %14 = arith.addf %11, %13 : vector<32x128xf32>
    %cst_11 = arith.constant 0.000000e+00 : f32
    %15 = vector.broadcast %cst_11 : f32 to vector<32x128xf32>
    %16 = arith.maximumf %14, %15 : vector<32x128xf32>
    %c0_12 = arith.constant 0 : index
    %c0_13 = arith.constant 0 : index
    %17 = vector.load %arg7[%c0_12, %c0_13] : memref<8x32xbf16, #tpu.memory_space<vmem>>, vector<8x32xbf16>
    %18 = arith.truncf %16 : vector<32x128xf32> to vector<32x128xbf16>
    %cst_14 = arith.constant dense<0.000000e+00> : vector<8x128xf32>
    %19 = tpu.matmul %17, %18, %cst_14 {dimension_numbers = #tpu.dot_dimension_numbers<[1], [0], [0], [1], [0, 0, 1, 1], [], []>} : vector<8x32xbf16>, vector<32x128xbf16>, vector<8x128xf32> -> vector<8x128xf32>
    %c0_15 = arith.constant 0 : index
    %c0_16 = arith.constant 0 : index
    %20 = vector.load %arg8[%c0_15, %c0_16] : memref<8x1xf32, #tpu.memory_space<vmem>>, vector<8x1xf32>
    %21 = vector.broadcast %20 : vector<8x1xf32> to vector<8x128xf32>
    %22 = arith.addf %19, %21 : vector<8x128xf32>
    %23 = math.tanh %22 : vector<8x128xf32>
    %cst_17 = arith.constant 1.000000e+00 : f32
    %24 = vector.broadcast %cst_17 : f32 to vector<8x128xf32>
    %25 = arith.mulf %23, %24 : vector<8x128xf32>
    %c0_18 = arith.constant 0 : index
    %c0_19 = arith.constant 0 : index
    %26 = vector.load %arg2[%c0_18, %c0_19] : memref<8x128xf32, #tpu.memory_space<vmem>>, vector<8x128xf32>
    %c0_20 = arith.constant 0 : index
    %c0_21 = arith.constant 0 : index
    %27 = vector.load %arg9[%c0_20, %c0_21] : memref<8x1xf32, #tpu.memory_space<vmem>>, vector<8x1xf32>
    %28 = vector.broadcast %27 : vector<8x1xf32> to vector<8x128xf32>
    %29 = arith.mulf %28, %26 : vector<8x128xf32>
    %30 = arith.addf %25, %29 : vector<8x128xf32>
    %c0_22 = arith.constant 0 : index
    %c0_23 = arith.constant 0 : index
    %31 = vector.load %arg10[%c0_22, %c0_23] : memref<8x128xf32, #tpu.memory_space<vmem>>, vector<8x128xf32>
    tpu.vector_store %arg10[%c0_22, %c0_23], %30 {strides = array<i32>} : memref<8x128xf32, #tpu.memory_space<vmem>>, vector<8x128xf32>,
    %32 = arith.mulf %26, %26 : vector<8x128xf32>
    %cst_24 = arith.constant dense<0.000000e+00> : vector<128xf32>
    %33 = vector.multi_reduction <add>, %32, %cst_24 [0] : vector<8x128xf32> to vector<128xf32>
    %34 = vector.shape_cast %33 : vector<128xf32> to vector<1x128xf32>
    %cst_25 = arith.constant -5.000000e-01 : f32
    %35 = vector.broadcast %cst_25 : f32 to vector<1x128xf32>
    %36 = arith.mulf %35, %34 : vector<1x128xf32>
    %c0_26 = arith.constant 0 : index
    %c0_27 = arith.constant 0 : index
    %37 = vector.load %arg11[%c0_26, %c0_27] : memref<1x128xf32, #tpu.memory_space<vmem>>, vector<1x128xf32>
    tpu.vector_store %arg11[%c0_26, %c0_27], %36 {strides = array<i32>} : memref<1x128xf32, #tpu.memory_space<vmem>>, vector<1x128xf32>,
    return
  }
  func.func @transform_0(%arg0: i32) -> (i32, i32) {
    %c0_i32 = arith.constant 0 : i32
    %c0_i32_0 = arith.constant 0 : i32
    return %c0_i32, %arg0 : i32, i32
  }
  func.func @transform_1(%arg0: i32) -> (i32, i32) {
    %c0_i32 = arith.constant 0 : i32
    %c0_i32_0 = arith.constant 0 : i32
    return %c0_i32, %arg0 : i32, i32
  }
  func.func @transform_2(%arg0: i32) -> (i32, i32) {
    %c0_i32 = arith.constant 0 : i32
    %c0_i32_0 = arith.constant 0 : i32
    %c0_i32_1 = arith.constant 0 : i32
    return %c0_i32, %c0_i32_0 : i32, i32
  }
  func.func @transform_3(%arg0: i32) -> (i32, i32) {
    %c0_i32 = arith.constant 0 : i32
    %c0_i32_0 = arith.constant 0 : i32
    %c0_i32_1 = arith.constant 0 : i32
    return %c0_i32, %c0_i32_0 : i32, i32
  }
  func.func @transform_4(%arg0: i32) -> (i32, i32) {
    %c0_i32 = arith.constant 0 : i32
    %c0_i32_0 = arith.constant 0 : i32
    %c0_i32_1 = arith.constant 0 : i32
    return %c0_i32, %c0_i32_0 : i32, i32
  }
  func.func @transform_5(%arg0: i32) -> (i32, i32) {
    %c0_i32 = arith.constant 0 : i32
    %c0_i32_0 = arith.constant 0 : i32
    %c0_i32_1 = arith.constant 0 : i32
    return %c0_i32, %c0_i32_0 : i32, i32
  }
  func.func @transform_6(%arg0: i32) -> (i32, i32) {
    %c0_i32 = arith.constant 0 : i32
    %c0_i32_0 = arith.constant 0 : i32
    %c0_i32_1 = arith.constant 0 : i32
    return %c0_i32, %c0_i32_0 : i32, i32
  }
  func.func @transform_7(%arg0: i32) -> (i32, i32) {
    %c0_i32 = arith.constant 0 : i32
    %c0_i32_0 = arith.constant 0 : i32
    %c0_i32_1 = arith.constant 0 : i32
    return %c0_i32, %c0_i32_0 : i32, i32
  }
  func.func @transform_8(%arg0: i32) -> (i32, i32) {
    %c0_i32 = arith.constant 0 : i32
    %c0_i32_0 = arith.constant 0 : i32
    %c0_i32_1 = arith.constant 0 : i32
    return %c0_i32, %c0_i32_0 : i32, i32
  }
  func.func @transform_9(%arg0: i32) -> (i32, i32) {
    %c0_i32 = arith.constant 0 : i32
    %c0_i32_0 = arith.constant 0 : i32
    return %c0_i32, %arg0 : i32, i32
  }
  func.func @transform_10(%arg0: i32) -> (i32, i32) {
    %c0_i32 = arith.constant 0 : i32
    %c0_i32_0 = arith.constant 0 : i32
    return %c0_i32, %arg0 : i32, i32
  }
}

</mosaic_0001>

<bundles_post_ra>
// kernel: tpu_custom_call.1
= control target key start
LH: loop header
LB: loop body
LE: loop exit
PB: predicated region body
PF: predicated region fallthrough
CT: control target
= control target key end

     0   :  { %16 = vsyncpa [#allocation3], 0  ;;  %vm78_vm0 = vcmask 130048   ;;  %v440_v4 = vmov 0   ;;  %s583_s0 = inlined_call_operand.vmem [shape: f32[16,128], index: 0, kind: input, shape index: {}]   ;;  %s584_s1 = inlined_call_operand.vmem [shape: f32[8,128], index: 1, kind: input, shape index: {}]   ;;  %s585_s2 = inlined_call_operand.vmem [shape: bf16[32,16], index: 2, kind: input, shape index: {}]   ;;  %s586_s3 = inlined_call_operand.vmem [shape: f32[32,1], index: 3, kind: input, shape index: {}]   ;;  %s587_s4 = inlined_call_operand.vmem [shape: bf16[32,32], index: 4, kind: input, shape index: {}]   ;;  %s588_s5 = inlined_call_operand.vmem [shape: f32[32,1], index: 5, kind: input, shape index: {}]   ;;  %s589_s6 = inlined_call_operand.vmem [shape: bf16[8,32], index: 6, kind: input, shape index: {}]   ;;  %s590_s7 = inlined_call_operand.vmem [shape: f32[8,1], index: 7, kind: input, shape index: {}]   ;;  %s591_s8 = inlined_call_operand.vmem [shape: f32[8,1], index: 8, kind: input, shape index: {}]   ;;  %s592_s9 = inlined_call_operand.hbm [shape: f32[8,128], index: 9, kind: output, shape index: {0}]   ;;  %s593_s10 = inlined_call_operand.hbm [shape: f32[1,128], index: 10, kind: output, shape index: {1}]  }
   0x1   :  { %v37_v0 = vld [vmem:[%s583_s0] sm:$0xff]  ;;  %v38_v1 = vld [vmem:[%s583_s0 + $0x8] sm:$0xff]  ;;  %384 = vset.pattern.permute.xlu0 %v440_v4  ;;  %385 = vset.pattern.permute.xlu1 %v440_v4  ;;  %v46_v7 = vld [vmem:[%s586_s3 + $0x10] sm:$0xff] }
   0x2   :  { %v39_v2 = vpack.c.bf16 %v38_v1, %v37_v0  ;;  %v386_v3 = vld [vmem:[%s585_s2] sm:$0xff]   ;;  %v387_v6 = vld [vmem:[%s585_s2 + $0x8] sm:$0xff]   ;;  %60 = vperm.xlu1 %385, %v46_v7   ;;  %v47_v9 = vld [vmem:[%s586_s3 + $0x18] sm:$0xff] }
   0x3   :  { %v44_v5 = vld [vmem:[%s586_s3] sm:$0xff]  ;;  %359 = vmatprep.mubr.msk.bf16.mxu0 %vm78_vm0, %v386_v3  ;;  %v45_v8 = vld [vmem:[%s586_s3 + $0x8] sm:$0xff] }
   0x4   :  { %357 = vmatprep.subr.bf16.mxu0 %v39_v2  ;;  %50 = vperm.xlu0 %384, %v44_v5  }
   0x5   :  { %358 = vmatpush3.bf16.msra.mxu0 %v39_v2 }
   0x8   :  { %360 = vmatmul.mubr.msk.bf16.vlgmr.msra.gmra.mrb[0].mxu0 %vm78_vm0, %v387_v6 }
   0x9   :  { %17 = vsyncpa [#allocation5], 0  ;;  %55 = vperm.xlu0 %384, %v45_v8   ;;  %65 = vperm.xlu1 %385, %v47_v9   ;;  %v144_v10 = vld [vmem:[%s588_s5] sm:$0xff]  ;;  %v145_v11 = vld [vmem:[%s588_s5 + $0x8] sm:$0xff]  ;;  %vm178_vm1 = vcmask 261120   ;;  %v441_v36 = vmov 0.0  }
   0xa   :  { %v146_v12 = vld [vmem:[%s588_s5 + $0x10] sm:$0xff]  ;;  %v147_v13 = vld [vmem:[%s588_s5 + $0x18] sm:$0xff]  ;;  %v241_v14 = vld [vmem:[%s590_s7] sm:$0xff]  ;;  %371 = vmatprep.subr.bf16.mxu0 %v441_v36  ;;  %vm442_vm2 = vmmov 0   ;;  %s443_s22 = smov [#allocation4]  }
   0xb   :  { %v292_v15 = vld [vmem:[%s591_s8] sm:$0xff]  ;;  %v389_v35 = vld [vmem:[%s587_s4 + $0x8] sm:$0xff]   ;;  %375 = vmatprep.mubr.msk.bf16.mxu0 %vm442_vm2, %v441_v36  ;;  %s326_s0 = sshll.u32 %s443_s22, 4  ;;  %s327_s0 = int_to_ptr.vmem [resolvable:$true] %s326_s0 }
   0xc   :  { %v388_v16 = vld [vmem:[%s587_s4] sm:$0xff]   ;;  %s392_s23 = scalar_lea.vmem %s327_s0, 16  ;;  %p397_p1 = scmp.lt.s32.totalorder %s327_s0, %s327_s0 }
   0xd   :  { %150 = vperm.xlu0 %384, %v144_v10   ;;  %155 = vperm.xlu1 %385, %v145_v11   ;;  %v238_v55 = vld [vmem:[%s589_s6] sm:$0xf]  ;;  %p393_p0 = scmp.ne.s32.totalorder %s327_s0, %s392_s23  ;;  %s396_s6 = scalar_lea.vmem %s327_s0, 32 }
   0xe   :  { %367 = vmatprep.mubr.msk.bf16.mxu1 %vm178_vm1, %v388_v16  ;;  %v291_v56 = vld [vmem:[%s584_s1] sm:$0xff]  ;;  %p398_p2 = scmp.lt.s32.totalorder %s396_s6, %s392_s23 }
   0xf   :  { %v301_v57 = vmul.f32 %v291_v56, %v291_v56 }
  0x10   :  { %p399_p3 = por %p398_p2, %p397_p1 }
  0x11   :  { %160 = vperm.xlu0 %384, %v146_v12   ;;  %165 = vperm.xlu1 %385, %v147_v13   ;;  %v302_v58 = vrot.slane %v301_v57, 4 }
  0x12   :  { %p400_p4 = pnand %p399_p3, %p393_p0 }
  0x13   :  { %v303_v59 = vadd.f32 %v302_v58, %v301_v57 }
  0x15   :  { %244 = vperm.xlu0 %384, %v241_v14   ;;  %295 = vperm.xlu1 %385, %v292_v15   ;;  %v304_v60 = vrot.slane %v303_v59, 2 }
  0x17   :  { %v305_v61 = vadd.f32 %v304_v60, %v303_v59 }
  0x19   :  { %v306_v62 = vrot.slane %v305_v61, 1 }
  0x1b   :  { %v307_v63 = vadd.f32 %v306_v62, %v305_v61 }
  0x1d   :  { %v308_v0 = vmul.f32 -0.5, %v307_v63 }
  0x1f   :  { %309 = vst [vmem:[#allocation4] sm:$0x1] %v308_v0 }
  0x81   :  { %v61_v17 = vpop.permute.xlu1 %60 }
  0x83   :  { %v51_v18 = vpop.permute.xlu0 %50 }
  0x88   :  { %v66_v22 = vpop.permute.xlu1 %65  ;;  %v56_v25 = vpop.permute.xlu0 %55 }
  0x8c   :  { %v151_v37 = vpop.permute.xlu0 %150  ;;  %v156_v38 = vpop.permute.xlu1 %155 }
  0x90   :  { %v161_v39 = vpop.permute.xlu0 %160  ;;  %v166_v43 = vpop.permute.xlu1 %165 }
  0xdb   :  { %v361_v19 = vpop.f32.mrb[0].mxu0 }
  0xdc   :  { %v128_v20 = vadd.f32 %v361_v19, %v61_v17  ;;  %v119_v21 = vpop.f32.mrb[1].mxu0 }
  0xdd   :  { %v120_v23 = vadd.f32 %v119_v21, %v51_v18  ;;  %v362_v24 = vpop.f32.mrb[2].mxu0 }
  0xde   :  { %v131_v26 = vadd.f32 %v362_v24, %v66_v22  ;;  %v122_v27 = vpop.f32.mrb[3].mxu0  ;;  %v136_v29 = vmax.f32 %v128_v20, 0.0 }
  0xdf   :  { %v123_v28 = vadd.f32 %v122_v27, %v56_v25  ;;  %v134_v31 = vmax.f32 %v120_v23, 0.0 }
  0xe0   :  { %v137_v30 = vmax.f32 %v131_v26, 0.0 }
  0xe1   :  { %v135_v32 = vmax.f32 %v123_v28, 0.0 }
  0xe2   :  { %v143_v33 = vpack.c.bf16 %v137_v30, %v136_v29 }
  0xe3   :  { %v142_v34 = vpack.c.bf16 %v135_v32, %v134_v31 }
  0xe5   :  { %363 = vmatprep.subr.bf16.mxu1 %v142_v34 }
  0xe6   :  { %364 = vmatpush3.bf16.msra.mxu1 %v142_v34 }
  0xe7   :  { %365 = vmatprep.subr.bf16.mxu1 %v143_v33 }
  0xea   :  { %366 = vmatpush3.bf16.msra.mxu1 %v143_v33 }
  0xed   :  { %368 = vmatmul.mubr.msk.bf16.vlgmr.msra.gmra.mrb[0].mxu1 %vm178_vm1, %v389_v35 }
 0x1c0   :  { %v369_v40 = vpop.f32.mrb[0].mxu1 }
 0x1c1   :  { %v228_v41 = vadd.f32 %v369_v40, %v161_v39  ;;  %v219_v42 = vpop.f32.mrb[1].mxu1 }
 0x1c2   :  { %v220_v44 = vadd.f32 %v219_v42, %v151_v37  ;;  %v370_v45 = vpop.f32.mrb[2].mxu1 }
 0x1c3   :  { %v231_v46 = vadd.f32 %v370_v45, %v166_v43  ;;  %v222_v47 = vpop.f32.mrb[3].mxu1  ;;  %v236_v49 = vmax.f32 %v228_v41, 0.0 }
 0x1c4   :  { %v223_v48 = vadd.f32 %v222_v47, %v156_v38  ;;  %v234_v51 = vmax.f32 %v220_v44, 0.0 }
 0x1c5   :  { %v237_v50 = vmax.f32 %v231_v46, 0.0 }
 0x1c6   :  { %v235_v52 = vmax.f32 %v223_v48, 0.0 }
 0x1c7   :  { %v240_v53 = vpack.c.bf16 %v237_v50, %v236_v49 }
 0x1c8   :  { %v239_v54 = vpack.c.bf16 %v235_v52, %v234_v51 }
 0x1ca   :  { %372 = vmatpush3.bf16.msra.mxu0 %v239_v54 }
 0x1cb   :  { %373 = vmatprep.subr.bf16.mxu0 %v441_v36 }
 0x1ce   :  { %374 = vmatpush3.bf16.msra.mxu0 %v240_v53 }
 0x1d1   :  { %376 = vmatmul.mubr.msk.bf16.vlgmr.msra.gmra.mrb[4].mxu0 %vm178_vm1, %v238_v55 }
 0x1d2   :  { %403 = shalt.err (!%p400_p4)
}
 0x1d3   :  { %s404_s25 = scalar_lea.hbm %s593_s10, 16 }
 0x1d4   :  { %p405_p5 = scmp.ne.s32.totalorder %s593_s10, %s404_s25  ;;  %p408_p6 = scmp.lt.u32.totalorder %s404_s25, %s593_s10 }
 0x1d6   :  { %p410_p7 = pnand %p408_p6, %p405_p5 }
 0x1d8   :  { %413 = shalt.err (!%p410_p7)
}
 0x1d9   :  { %329 = dma.vmem_to_hbm [thread:$0]  %s327_s0, 16, %s593_s10, [#allocation5]   ;;  %v245_v1 = vpop.permute.xlu0 %244  ;;  %v296_v7 = vpop.permute.xlu1 %295 }
 0x1da   :  { %s444_s11 = smov [#allocation2]   ;;  %v298_v8 = vmul.f32 %v296_v7, %v291_v56 }
 0x1db   :  { %s316_s12 = sshll.u32 %s444_s11, 4  ;;  %s317_s12 = int_to_ptr.vmem [resolvable:$true] %s316_s12 }
 0x1dc   :  { %s414_s3 = scalar_lea.vmem %s317_s12, 128  ;;  %p419_p9 = scmp.lt.s32.totalorder %s317_s12, %s317_s12 }
 0x1dd   :  { %p415_p8 = scmp.ne.s32.totalorder %s317_s12, %s414_s3  ;;  %p420_p10 = scmp.lt.s32.totalorder %s414_s3, %s414_s3 }
 0x1df   :  { %p421_p11 = por %p420_p10, %p419_p9 }
 0x1e1   :  { %p422_p12 = pnand %p421_p11, %p415_p8 }
 0x2a4   :  { %v284_v2 = vpop.f32.mrb[4].mxu0 }
 0x2a5   :  { %v285_v3 = vadd.f32 %v284_v2, %v245_v1  ;;  %v377_v4 = vpop.f32.mrb[5].mxu0 }
 0x2a6   :  { %v287_v5 = vpop.f32.mrb[6].mxu0 }
 0x2a7   :  { %390 = vtanh.f32 %v285_v3  ;;  %v378_v6 = vpop.f32.mrb[7].mxu0 }
 0x2b1   :  { %v391_v9 = vpop.eup %390 }
 0x2b2   :  { %v299_v10 = vadd.f32 %v391_v9, %v298_v8 }
 0x2b4   :  { %300 = vst [vmem:[#allocation2] sm:$0xff] %v299_v10 }
 0x2b5   :  { %425 = shalt.err (!%p422_p12)
}
 0x2b6   :  { %s426_s14 = scalar_lea.hbm %s592_s9, 128 }
 0x2b7   :  { %p427_p13 = scmp.ne.s32.totalorder %s592_s9, %s426_s14  ;;  %p430_p0 = scmp.lt.u32.totalorder %s426_s14, %s592_s9 }
 0x2b9   :  { %p432_p1 = pnand %p430_p0, %p427_p13 }
 0x2bb   :  { %435 = shalt.err (!%p432_p1)
}
 0x2bc   :  { %319 = dma.vmem_to_hbm [thread:$0]  %s317_s12, 128, %s592_s9, [#allocation3]  }
 0x2bd   :  { %436 = dma.done.wait [#allocation3], 128  }
 0x2be   :  { %437 = vsyncadd [#allocation3], 4294967168 }
 0x2bf   :  { %438 = dma.done.wait [#allocation5], 16  }
 0x2c0   :  { %439 = vsyncadd [#allocation5], 4294967280 }
 0x2c1   :  { %336 = vsyncpa [#allocation3], 1 }
 0x2c2   :  { %337 = vsyncpa [#allocation5], 1 }

</bundles_post_ra>
